<compile_context>
chip_gen: v7x
topology: tpu7x:2x2x1
jax: 0.10.0
libtpu: 0.0.40
codegen_flags: <defaults>
</compile_context>

<pallas_src>
import functools
import math

import jax
import jax.numpy as jnp
import numpy as np
from jax.experimental import pallas as pl
from jax.experimental.pallas import tpu as pltpu


def _round_up(v, m):
    return (v + m - 1) // m * m


def _mha_kernel(x_ref, wqkv_ref, wfc_ref, bfc_ref, o_ref, concat_ref, *,
                num_heads, head_dim_p, seq_len, block_b):
    """One grid step processes `block_b` batch rows, flattened to (block_b*S, Ep).

    x_ref      : (block_b*S, Ep)  f32   VMEM (lane-dense: Ep % 128 == 0)
    wqkv_ref   : (Ep, 3*Ep)       bf16  VMEM resident (pre-transposed, head-major cols,
                                        1/sqrt(Dh) already folded into the Q block)
    wfc_ref    : (Ep, Ep)         bf16  VMEM resident (pre-transposed W_fc^T)
    bfc_ref    : (1, Ep)          f32   VMEM
    o_ref      : (block_b*S, Ep)  f32   VMEM
    concat_ref : (block_b*S, Ep)  f32   VMEM scratch (head outputs written in place)
    """
    H, Dhp, S, Bb = num_heads, head_dim_p, seq_len, block_b
    Ep = H * Dhp
    rows = Bb * S

    # 1) Fused Q/K/V projection: ONE bf16 MXU matmul with f32 accumulation.
    x_bf16 = x_ref[...].astype(jnp.bfloat16)
    qkv = jnp.dot(x_bf16, wqkv_ref[...],
                  preferred_element_type=jnp.float32)              # (rows, 3*Ep) f32

    # 2) Per-head attention, batched over the block's batch rows (flash-style einsums).
    #    Softmax stays f32; matmul operands are bf16.
    for h in range(H):                                             # static unroll over heads
        c0 = h * Dhp
        q = qkv[:, c0:c0 + Dhp]                                    # already scaled by 1/sqrt(Dh)
        k = qkv[:, Ep + c0:Ep + c0 + Dhp]
        v = qkv[:, 2 * Ep + c0:2 * Ep + c0 + Dhp]
        q3 = q.reshape(Bb, S, Dhp).astype(jnp.bfloat16)
        k3 = k.reshape(Bb, S, Dhp).astype(jnp.bfloat16)
        v3 = v.reshape(Bb, S, Dhp).astype(jnp.bfloat16)

        s = jnp.einsum('bqd,bkd->bqk', q3, k3,
                       preferred_element_type=jnp.float32)         # (Bb, S, S) f32
        s = s - jnp.max(s, axis=-1, keepdims=True)
        p = jnp.exp(s)
        inv_denom = pl.reciprocal(jnp.sum(p, axis=-1, keepdims=True), approx=True)
        ho = jnp.einsum('bqk,bkd->bqd', p.astype(jnp.bfloat16), v3,
                        preferred_element_type=jnp.float32) * inv_denom  # (Bb, S, Dhp) f32

        # Write the head output straight into the concat scratch (no list/concatenate).
        concat_ref[:, c0:c0 + Dhp] = ho.reshape(rows, Dhp)

    # 3) Fused output projection + bias; minimal f32 epilogue, one lane-dense store.
    out = jnp.dot(concat_ref[...].astype(jnp.bfloat16), wfc_ref[...],
                  preferred_element_type=jnp.float32) + bfc_ref[...]
    o_ref[...] = out.astype(o_ref.dtype)


def _pick_vmem_limit():
    """~85% of this generation's VMEM (v5e/v6e: 128 MiB, v7x: 64 MiB); safe fallback."""
    try:
        cap = getattr(pltpu.get_tpu_info(), "vmem_capacity_bytes", None)
        if cap:
            return int(max(32 << 20, min(int(cap * 0.85), 112 << 20)))
    except Exception:
        pass
    return 48 << 20  # safe on every generation, incl. v7x's 64 MiB VMEM


def _pick_block_b(B, S, Ep, itemsize, budget_bytes):
    """Batch rows per grid step.

    Target a few MiB of per-step activations (amortizes ~0.35us/step overhead and short
    DMAs) while (a) preferring an EVEN number of grid steps >= 2 so the 'parallel' batch
    axis shards cleanly across v7x's two TensorCores, and (b) keeping the in-kernel
    (Bb*S, Dh) -> (Bb, S, Dh) reshape a pure vreg relabel (S % 8 == 0)."""
    per_row = (S * Ep * itemsize          # x block
               + 3 * S * Ep * 4           # qkv (f32)
               + 2 * S * S * 4            # scores + probs for one live head (f32)
               + S * Ep * 4               # concat scratch (f32)
               + S * Ep * itemsize)       # output block
    target = max(1, budget_bytes // max(per_row, 1))
    cands = [d for d in range(1, B + 1) if B % d == 0 and d <= target]
    if not cands:
        return 1
    even_multi = [d for d in cands if (B // d) >= 2 and (B // d) % 2 == 0]
    multi = [d for d in cands if (B // d) >= 2]
    pool = even_multi or multi or cands
    bb = max(pool)
    if S % 8 != 0:
        bb = 1
    return bb


def multihead_attention(x, wq, wk, wv, wfc, bfc, *, block_b=None, vmem_limit_bytes=None):
    """x: (B, S, E); wq/wk/wv: (H, Dh, E); wfc: (E, E); bfc: (E,)."""
    B, S, E = x.shape
    H, Dh, E_in = wq.shape
    assert E_in == E and H * Dh == E

    # Lane-dense padding: pad head_dim so Ep = H * Dhp is a multiple of 128 (unmasked
    # output stores, lane-aligned q/k/v slab boundaries). No-op when E % 128 == 0.
    step = 128 // math.gcd(H, 128)
    Dhp = _round_up(Dh, step)
    Ep = H * Dhp

    inv_scale = 1.0 / math.sqrt(float(Dh))   # scale uses the REAL head dim (matches PyTorch)

    def head_major_t(w):                     # (H, Dh, E) -> padded, transposed (Ep, Ep)
        wt = jnp.transpose(w, (2, 0, 1))     # (E, H, Dh) == W^T with head-major columns
        wt = jnp.pad(wt, ((0, Ep - E), (0, 0), (0, Dhp - Dh)))
        return wt.reshape(Ep, Ep)

    # Fused pre-transposed QKV weight; 1/sqrt(Dh) folded into Q; bf16 for the MXU.
    wqkv_t = jnp.concatenate(
        [head_major_t(wq * inv_scale), head_major_t(wk), head_major_t(wv)],
        axis=1).astype(jnp.bfloat16)                                   # (Ep, 3*Ep)

    # Output projection W_fc^T, rows rearranged/padded to the head-major concat layout.
    wfc_t = jnp.pad(wfc.T.reshape(H, Dh, E),
                    ((0, 0), (0, Dhp - Dh), (0, Ep - E))).reshape(Ep, Ep).astype(jnp.bfloat16)
    bfc_p = jnp.pad(bfc, (0, Ep - E)).reshape(1, Ep).astype(jnp.float32)

    # Lane-dense 2-D activation slab (B*S, Ep).
    x_p = jnp.pad(x, ((0, 0), (0, 0), (0, Ep - E))) if Ep != E else x
    x2 = x_p.reshape(B * S, Ep)

    if vmem_limit_bytes is None:
        vmem_limit_bytes = _pick_vmem_limit()
    if block_b is None:
        weight_bytes = wqkv_t.size * 2 + wfc_t.size * 2     # resident bf16 weights
        budget = max(1 << 20, min(8 << 20, vmem_limit_bytes // 3 - weight_bytes))
        block_b = _pick_block_b(B, S, Ep, x.dtype.itemsize, budget)
    assert B % block_b == 0
    rows_per_step = block_b * S
    assert rows_per_step % 8 == 0 or rows_per_step == B * S, (
        "block row count must be a multiple of 8 (pad the sequence length)")
    n_steps = B // block_b

    # TODO(synk): for long sequences (S >= ~512) add flash-style KV tiling (second
    # 'arbitrary' grid axis with online-softmax m/l scratch) instead of full (S,S) scores;
    # for large E stream weight tiles / pipeline_mode=pl.Buffered(1) to fit v7x's 64 MiB.

    kernel = functools.partial(_mha_kernel, num_heads=H, head_dim_p=Dhp,
                               seq_len=S, block_b=block_b)

    out2 = pl.pallas_call(
        kernel,
        out_shape=jax.ShapeDtypeStruct((B * S, Ep), x.dtype),
        grid_spec=pltpu.PrefetchScalarGridSpec(
            num_scalar_prefetch=0,
            grid=(n_steps,),
            in_specs=[
                pl.BlockSpec((rows_per_step, Ep), lambda i: (i, 0)),   # activations
                pl.BlockSpec((Ep, 3 * Ep), lambda i: (0, 0)),          # fused Wqkv^T (resident)
                pl.BlockSpec((Ep, Ep), lambda i: (0, 0)),              # W_fc^T (resident)
                pl.BlockSpec((1, Ep), lambda i: (0, 0)),               # b_fc
            ],
            out_specs=pl.BlockSpec((rows_per_step, Ep), lambda i: (i, 0)),
            scratch_shapes=[pltpu.VMEM((rows_per_step, Ep), jnp.float32)],
        ),
        compiler_params=pltpu.CompilerParams(
            dimension_semantics=("parallel",),
            vmem_limit_bytes=int(vmem_limit_bytes),
        ),
    )(x2, wqkv_t, wfc_t, bfc_p)

    out = out2.reshape(B, S, Ep)
    return out[..., :E] if Ep != E else out


def _reference(x, wq, wk, wv, wfc, bfc):
    """Pure-JAX (f32) reference mirroring the PyTorch module."""
    H, Dh, E = wq.shape
    heads = []
    for h in range(H):
        q = x @ wq[h].T
        k = x @ wk[h].T
        v = x @ wv[h].T
        scores = (q @ jnp.swapaxes(k, -2, -1)) / math.sqrt(Dh)
        attn = jax.nn.softmax(scores, axis=-1)
        heads.append(attn @ v)
    concat = jnp.concatenate(heads, axis=-1)
    return concat @ wfc.T + bfc


if __name__ == "__main__":
    # Small shapes consistent with the module: embed_dim=32, num_heads=4 -> head_dim=8.
    B, S, E, H = 2, 8, 32, 4
    Dh = E // H

    key = jax.random.PRNGKey(0)
    kx, kq, kk, kv, kw, kb = jax.random.split(key, 6)

    x = jax.random.normal(kx, (B, S, E), dtype=jnp.float32)
    # nn.Linear weight shape = (out_features, in_features).
    wq = jax.random.normal(kq, (H, Dh, E), dtype=jnp.float32) * 0.1
    wk = jax.random.normal(kk, (H, Dh, E), dtype=jnp.float32) * 0.1
    wv = jax.random.normal(kv, (H, Dh, E), dtype=jnp.float32) * 0.1
    wfc = jax.random.normal(kw, (E, E), dtype=jnp.float32) * 0.1
    bfc = jax.random.normal(kb, (E,), dtype=jnp.float32) * 0.1

    out = jax.block_until_ready(multihead_attention(x, wq, wk, wv, wfc, bfc))

    ref = _reference(x, wq, wk, wv, wfc, bfc)
    # Tolerance covers bf16 matmul operands (f32 accumulation) and the approximate EUP
    # reciprocal in the softmax normalization.
    np.testing.assert_allclose(np.asarray(out), np.asarray(ref), rtol=2e-2, atol=2e-2)

    print("KERNEL_OK")
</pallas_src>

<mosaic_0001>
module attributes {stable_mosaic.version = 11 : i64} {
  func.func @_mha_kernel(%arg0: i32, %arg1: memref<8x128xf32, #tpu.memory_space<vmem>>, %arg2: memref<128x384xbf16, #tpu.memory_space<vmem>>, %arg3: memref<128x128xbf16, #tpu.memory_space<vmem>>, %arg4: memref<1x128xf32, #tpu.memory_space<vmem>>, %arg5: memref<8x128xf32, #tpu.memory_space<vmem>>, %arg6: memref<8x128xf32, #tpu.memory_space<vmem>>) attributes {dimension_semantics = [#tpu.dimension_semantics<parallel>], iteration_bounds = array<i64: 2>, scalar_prefetch = 0 : i64, scratch_operands = 1 : i64, tpu.core_type = #tpu.core_type<tc>, window_params = [{transform_indices = @transform_0, window_bounds = array<i64: 8, 128>}, {pipeline_mode = #tpu.pipeline_mode<synchronous>, transform_indices = @transform_1, window_bounds = array<i64: 128, 384>}, {pipeline_mode = #tpu.pipeline_mode<synchronous>, transform_indices = @transform_2, window_bounds = array<i64: 128, 128>}, {pipeline_mode = #tpu.pipeline_mode<synchronous>, transform_indices = @transform_3, window_bounds = array<i64: 1, 128>}, {transform_indices = @transform_4, window_bounds = array<i64: 8, 128>}]} {
    %c0 = arith.constant 0 : index
    %c0_0 = arith.constant 0 : index
    %0 = vector.load %arg1[%c0, %c0_0] : memref<8x128xf32, #tpu.memory_space<vmem>>, vector<8x128xf32>
    %1 = arith.truncf %0 : vector<8x128xf32> to vector<8x128xbf16>
    %c0_1 = arith.constant 0 : index
    %c0_2 = arith.constant 0 : index
    %2 = vector.load %arg2[%c0_1, %c0_2] : memref<128x384xbf16, #tpu.memory_space<vmem>>, vector<128x384xbf16>
    %cst = arith.constant dense<0.000000e+00> : vector<8x384xf32>
    %3 = tpu.matmul %1, %2, %cst {dimension_numbers = #tpu.dot_dimension_numbers<[1], [0], [0], [1], [0, 0, 1, 1], [], []>} : vector<8x128xbf16>, vector<128x384xbf16>, vector<8x384xf32> -> vector<8x384xf32>
    %4 = vector.extract_strided_slice %3 {offsets = [0, 0], sizes = [8, 32], strides = [1, 1]} : vector<8x384xf32> to vector<8x32xf32>
    %5 = vector.extract_strided_slice %3 {offsets = [0, 128], sizes = [8, 32], strides = [1, 1]} : vector<8x384xf32> to vector<8x32xf32>
    %6 = vector.extract_strided_slice %3 {offsets = [0, 256], sizes = [8, 32], strides = [1, 1]} : vector<8x384xf32> to vector<8x32xf32>
    %7 = vector.shape_cast %4 : vector<8x32xf32> to vector<1x8x32xf32>
    %8 = arith.truncf %7 : vector<1x8x32xf32> to vector<1x8x32xbf16>
    %9 = vector.shape_cast %5 : vector<8x32xf32> to vector<1x8x32xf32>
    %10 = arith.truncf %9 : vector<1x8x32xf32> to vector<1x8x32xbf16>
    %11 = vector.shape_cast %6 : vector<8x32xf32> to vector<1x8x32xf32>
    %12 = arith.truncf %11 : vector<1x8x32xf32> to vector<1x8x32xbf16>
    "tpu.trace_start"() <{level = 10 : i32, message = "bqd,bkd->bqk"}> : () -> ()
    %cst_3 = arith.constant dense<0.000000e+00> : vector<1x8x8xf32>
    %13 = tpu.matmul %8, %10, %cst_3 {dimension_numbers = #tpu.dot_dimension_numbers<[2], [2], [1], [1], [0, 0, 0, 1, 1, 1], [0], [0]>} : vector<1x8x32xbf16>, vector<1x8x32xbf16>, vector<1x8x8xf32> -> vector<1x8x8xf32>
    "tpu.trace_stop"() : () -> ()
    %cst_4 = arith.constant dense<0xFF800000> : vector<1x8xf32>
    %14 = vector.multi_reduction <maximumf>, %13, %cst_4 [2] : vector<1x8x8xf32> to vector<1x8xf32>
    %15 = vector.shape_cast %14 : vector<1x8xf32> to vector<1x8x1xf32>
    %16 = vector.broadcast %15 : vector<1x8x1xf32> to vector<1x8x8xf32>
    %17 = arith.subf %13, %16 : vector<1x8x8xf32>
    %18 = math.exp %17 : vector<1x8x8xf32>
    %cst_5 = arith.constant dense<0.000000e+00> : vector<1x8xf32>
    %19 = vector.multi_reduction <add>, %18, %cst_5 [2] : vector<1x8x8xf32> to vector<1x8xf32>
    %20 = vector.shape_cast %19 : vector<1x8xf32> to vector<1x8x1xf32>
    %21 = tpu.reciprocal %20 {approx = true} : vector<1x8x1xf32> -> vector<1x8x1xf32>
    %22 = arith.truncf %18 : vector<1x8x8xf32> to vector<1x8x8xbf16>
    "tpu.trace_start"() <{level = 10 : i32, message = "bqk,bkd->bqd"}> : () -> ()
    %cst_6 = arith.constant dense<0.000000e+00> : vector<1x8x32xf32>
    %23 = tpu.matmul %22, %12, %cst_6 {dimension_numbers = #tpu.dot_dimension_numbers<[2], [1], [1], [2], [0, 0, 0, 1, 1, 2], [0], [0]>} : vector<1x8x8xbf16>, vector<1x8x32xbf16>, vector<1x8x32xf32> -> vector<1x8x32xf32>
    "tpu.trace_stop"() : () -> ()
    %24 = vector.broadcast %21 : vector<1x8x1xf32> to vector<1x8x32xf32>
    %25 = arith.mulf %23, %24 : vector<1x8x32xf32>
    %26 = vector.shape_cast %25 : vector<1x8x32xf32> to vector<8x32xf32>
    %c0_7 = arith.constant 0 : index
    %c0_8 = arith.constant 0 : index
    %27 = vector.load %arg6[%c0_7, %c0_8] : memref<8x128xf32, #tpu.memory_space<vmem>>, vector<8x32xf32>
    tpu.vector_store %arg6[%c0_7, %c0_8], %26 {strides = array<i32>} : memref<8x128xf32, #tpu.memory_space<vmem>>, vector<8x32xf32>,
    %28 = vector.extract_strided_slice %3 {offsets = [0, 32], sizes = [8, 32], strides = [1, 1]} : vector<8x384xf32> to vector<8x32xf32>
    %29 = vector.extract_strided_slice %3 {offsets = [0, 160], sizes = [8, 32], strides = [1, 1]} : vector<8x384xf32> to vector<8x32xf32>
    %30 = vector.extract_strided_slice %3 {offsets = [0, 288], sizes = [8, 32], strides = [1, 1]} : vector<8x384xf32> to vector<8x32xf32>
    %31 = vector.shape_cast %28 : vector<8x32xf32> to vector<1x8x32xf32>
    %32 = arith.truncf %31 : vector<1x8x32xf32> to vector<1x8x32xbf16>
    %33 = vector.shape_cast %29 : vector<8x32xf32> to vector<1x8x32xf32>
    %34 = arith.truncf %33 : vector<1x8x32xf32> to vector<1x8x32xbf16>
    %35 = vector.shape_cast %30 : vector<8x32xf32> to vector<1x8x32xf32>
    %36 = arith.truncf %35 : vector<1x8x32xf32> to vector<1x8x32xbf16>
    "tpu.trace_start"() <{level = 10 : i32, message = "bqd,bkd->bqk"}> : () -> ()
    %cst_9 = arith.constant dense<0.000000e+00> : vector<1x8x8xf32>
    %37 = tpu.matmul %32, %34, %cst_9 {dimension_numbers = #tpu.dot_dimension_numbers<[2], [2], [1], [1], [0, 0, 0, 1, 1, 1], [0], [0]>} : vector<1x8x32xbf16>, vector<1x8x32xbf16>, vector<1x8x8xf32> -> vector<1x8x8xf32>
    "tpu.trace_stop"() : () -> ()
    %cst_10 = arith.constant dense<0xFF800000> : vector<1x8xf32>
    %38 = vector.multi_reduction <maximumf>, %37, %cst_10 [2] : vector<1x8x8xf32> to vector<1x8xf32>
    %39 = vector.shape_cast %38 : vector<1x8xf32> to vector<1x8x1xf32>
    %40 = vector.broadcast %39 : vector<1x8x1xf32> to vector<1x8x8xf32>
    %41 = arith.subf %37, %40 : vector<1x8x8xf32>
    %42 = math.exp %41 : vector<1x8x8xf32>
    %cst_11 = arith.constant dense<0.000000e+00> : vector<1x8xf32>
    %43 = vector.multi_reduction <add>, %42, %cst_11 [2] : vector<1x8x8xf32> to vector<1x8xf32>
    %44 = vector.shape_cast %43 : vector<1x8xf32> to vector<1x8x1xf32>
    %45 = tpu.reciprocal %44 {approx = true} : vector<1x8x1xf32> -> vector<1x8x1xf32>
    %46 = arith.truncf %42 : vector<1x8x8xf32> to vector<1x8x8xbf16>
    "tpu.trace_start"() <{level = 10 : i32, message = "bqk,bkd->bqd"}> : () -> ()
    %cst_12 = arith.constant dense<0.000000e+00> : vector<1x8x32xf32>
    %47 = tpu.matmul %46, %36, %cst_12 {dimension_numbers = #tpu.dot_dimension_numbers<[2], [1], [1], [2], [0, 0, 0, 1, 1, 2], [0], [0]>} : vector<1x8x8xbf16>, vector<1x8x32xbf16>, vector<1x8x32xf32> -> vector<1x8x32xf32>
    "tpu.trace_stop"() : () -> ()
    %48 = vector.broadcast %45 : vector<1x8x1xf32> to vector<1x8x32xf32>
    %49 = arith.mulf %47, %48 : vector<1x8x32xf32>
    %50 = vector.shape_cast %49 : vector<1x8x32xf32> to vector<8x32xf32>
    %c0_13 = arith.constant 0 : index
    %c32 = arith.constant 32 : index
    %51 = vector.load %arg6[%c0_13, %c32] : memref<8x128xf32, #tpu.memory_space<vmem>>, vector<8x32xf32>
    tpu.vector_store %arg6[%c0_13, %c32], %50 {strides = array<i32>} : memref<8x128xf32, #tpu.memory_space<vmem>>, vector<8x32xf32>,
    %52 = vector.extract_strided_slice %3 {offsets = [0, 64], sizes = [8, 32], strides = [1, 1]} : vector<8x384xf32> to vector<8x32xf32>
    %53 = vector.extract_strided_slice %3 {offsets = [0, 192], sizes = [8, 32], strides = [1, 1]} : vector<8x384xf32> to vector<8x32xf32>
    %54 = vector.extract_strided_slice %3 {offsets = [0, 320], sizes = [8, 32], strides = [1, 1]} : vector<8x384xf32> to vector<8x32xf32>
    %55 = vector.shape_cast %52 : vector<8x32xf32> to vector<1x8x32xf32>
    %56 = arith.truncf %55 : vector<1x8x32xf32> to vector<1x8x32xbf16>
    %57 = vector.shape_cast %53 : vector<8x32xf32> to vector<1x8x32xf32>
    %58 = arith.truncf %57 : vector<1x8x32xf32> to vector<1x8x32xbf16>
    %59 = vector.shape_cast %54 : vector<8x32xf32> to vector<1x8x32xf32>
    %60 = arith.truncf %59 : vector<1x8x32xf32> to vector<1x8x32xbf16>
    "tpu.trace_start"() <{level = 10 : i32, message = "bqd,bkd->bqk"}> : () -> ()
    %cst_14 = arith.constant dense<0.000000e+00> : vector<1x8x8xf32>
    %61 = tpu.matmul %56, %58, %cst_14 {dimension_numbers = #tpu.dot_dimension_numbers<[2], [2], [1], [1], [0, 0, 0, 1, 1, 1], [0], [0]>} : vector<1x8x32xbf16>, vector<1x8x32xbf16>, vector<1x8x8xf32> -> vector<1x8x8xf32>
    "tpu.trace_stop"() : () -> ()
    %cst_15 = arith.constant dense<0xFF800000> : vector<1x8xf32>
    %62 = vector.multi_reduction <maximumf>, %61, %cst_15 [2] : vector<1x8x8xf32> to vector<1x8xf32>
    %63 = vector.shape_cast %62 : vector<1x8xf32> to vector<1x8x1xf32>
    %64 = vector.broadcast %63 : vector<1x8x1xf32> to vector<1x8x8xf32>
    %65 = arith.subf %61, %64 : vector<1x8x8xf32>
    %66 = math.exp %65 : vector<1x8x8xf32>
    %cst_16 = arith.constant dense<0.000000e+00> : vector<1x8xf32>
    %67 = vector.multi_reduction <add>, %66, %cst_16 [2] : vector<1x8x8xf32> to vector<1x8xf32>
    %68 = vector.shape_cast %67 : vector<1x8xf32> to vector<1x8x1xf32>
    %69 = tpu.reciprocal %68 {approx = true} : vector<1x8x1xf32> -> vector<1x8x1xf32>
    %70 = arith.truncf %66 : vector<1x8x8xf32> to vector<1x8x8xbf16>
    "tpu.trace_start"() <{level = 10 : i32, message = "bqk,bkd->bqd"}> : () -> ()
    %cst_17 = arith.constant dense<0.000000e+00> : vector<1x8x32xf32>
    %71 = tpu.matmul %70, %60, %cst_17 {dimension_numbers = #tpu.dot_dimension_numbers<[2], [1], [1], [2], [0, 0, 0, 1, 1, 2], [0], [0]>} : vector<1x8x8xbf16>, vector<1x8x32xbf16>, vector<1x8x32xf32> -> vector<1x8x32xf32>
    "tpu.trace_stop"() : () -> ()
    %72 = vector.broadcast %69 : vector<1x8x1xf32> to vector<1x8x32xf32>
    %73 = arith.mulf %71, %72 : vector<1x8x32xf32>
    %74 = vector.shape_cast %73 : vector<1x8x32xf32> to vector<8x32xf32>
    %c0_18 = arith.constant 0 : index
    %c64 = arith.constant 64 : index
    %75 = vector.load %arg6[%c0_18, %c64] : memref<8x128xf32, #tpu.memory_space<vmem>>, vector<8x32xf32>
    tpu.vector_store %arg6[%c0_18, %c64], %74 {strides = array<i32>} : memref<8x128xf32, #tpu.memory_space<vmem>>, vector<8x32xf32>,
    %76 = vector.extract_strided_slice %3 {offsets = [0, 96], sizes = [8, 32], strides = [1, 1]} : vector<8x384xf32> to vector<8x32xf32>
    %77 = vector.extract_strided_slice %3 {offsets = [0, 224], sizes = [8, 32], strides = [1, 1]} : vector<8x384xf32> to vector<8x32xf32>
    %78 = vector.extract_strided_slice %3 {offsets = [0, 352], sizes = [8, 32], strides = [1, 1]} : vector<8x384xf32> to vector<8x32xf32>
    %79 = vector.shape_cast %76 : vector<8x32xf32> to vector<1x8x32xf32>
    %80 = arith.truncf %79 : vector<1x8x32xf32> to vector<1x8x32xbf16>
    %81 = vector.shape_cast %77 : vector<8x32xf32> to vector<1x8x32xf32>
    %82 = arith.truncf %81 : vector<1x8x32xf32> to vector<1x8x32xbf16>
    %83 = vector.shape_cast %78 : vector<8x32xf32> to vector<1x8x32xf32>
    %84 = arith.truncf %83 : vector<1x8x32xf32> to vector<1x8x32xbf16>
    "tpu.trace_start"() <{level = 10 : i32, message = "bqd,bkd->bqk"}> : () -> ()
    %cst_19 = arith.constant dense<0.000000e+00> : vector<1x8x8xf32>
    %85 = tpu.matmul %80, %82, %cst_19 {dimension_numbers = #tpu.dot_dimension_numbers<[2], [2], [1], [1], [0, 0, 0, 1, 1, 1], [0], [0]>} : vector<1x8x32xbf16>, vector<1x8x32xbf16>, vector<1x8x8xf32> -> vector<1x8x8xf32>
    "tpu.trace_stop"() : () -> ()
    %cst_20 = arith.constant dense<0xFF800000> : vector<1x8xf32>
    %86 = vector.multi_reduction <maximumf>, %85, %cst_20 [2] : vector<1x8x8xf32> to vector<1x8xf32>
    %87 = vector.shape_cast %86 : vector<1x8xf32> to vector<1x8x1xf32>
    %88 = vector.broadcast %87 : vector<1x8x1xf32> to vector<1x8x8xf32>
    %89 = arith.subf %85, %88 : vector<1x8x8xf32>
    %90 = math.exp %89 : vector<1x8x8xf32>
    %cst_21 = arith.constant dense<0.000000e+00> : vector<1x8xf32>
    %91 = vector.multi_reduction <add>, %90, %cst_21 [2] : vector<1x8x8xf32> to vector<1x8xf32>
    %92 = vector.shape_cast %91 : vector<1x8xf32> to vector<1x8x1xf32>
    %93 = tpu.reciprocal %92 {approx = true} : vector<1x8x1xf32> -> vector<1x8x1xf32>
    %94 = arith.truncf %90 : vector<1x8x8xf32> to vector<1x8x8xbf16>
    "tpu.trace_start"() <{level = 10 : i32, message = "bqk,bkd->bqd"}> : () -> ()
    %cst_22 = arith.constant dense<0.000000e+00> : vector<1x8x32xf32>
    %95 = tpu.matmul %94, %84, %cst_22 {dimension_numbers = #tpu.dot_dimension_numbers<[2], [1], [1], [2], [0, 0, 0, 1, 1, 2], [0], [0]>} : vector<1x8x8xbf16>, vector<1x8x32xbf16>, vector<1x8x32xf32> -> vector<1x8x32xf32>
    "tpu.trace_stop"() : () -> ()
    %96 = vector.broadcast %93 : vector<1x8x1xf32> to vector<1x8x32xf32>
    %97 = arith.mulf %95, %96 : vector<1x8x32xf32>
    %98 = vector.shape_cast %97 : vector<1x8x32xf32> to vector<8x32xf32>
    %c0_23 = arith.constant 0 : index
    %c96 = arith.constant 96 : index
    %99 = vector.load %arg6[%c0_23, %c96] : memref<8x128xf32, #tpu.memory_space<vmem>>, vector<8x32xf32>
    tpu.vector_store %arg6[%c0_23, %c96], %98 {strides = array<i32>} : memref<8x128xf32, #tpu.memory_space<vmem>>, vector<8x32xf32>,
    %c0_24 = arith.constant 0 : index
    %c0_25 = arith.constant 0 : index
    %100 = vector.load %arg6[%c0_24, %c0_25] : memref<8x128xf32, #tpu.memory_space<vmem>>, vector<8x128xf32>
    %101 = arith.truncf %100 : vector<8x128xf32> to vector<8x128xbf16>
    %c0_26 = arith.constant 0 : index
    %c0_27 = arith.constant 0 : index
    %102 = vector.load %arg3[%c0_26, %c0_27] : memref<128x128xbf16, #tpu.memory_space<vmem>>, vector<128x128xbf16>
    %cst_28 = arith.constant dense<0.000000e+00> : vector<8x128xf32>
    %103 = tpu.matmul %101, %102, %cst_28 {dimension_numbers = #tpu.dot_dimension_numbers<[1], [0], [0], [1], [0, 0, 1, 1], [], []>} : vector<8x128xbf16>, vector<128x128xbf16>, vector<8x128xf32> -> vector<8x128xf32>
    %c0_29 = arith.constant 0 : index
    %c0_30 = arith.constant 0 : index
    %104 = vector.load %arg4[%c0_29, %c0_30] : memref<1x128xf32, #tpu.memory_space<vmem>>, vector<1x128xf32>
    %105 = vector.broadcast %104 : vector<1x128xf32> to vector<8x128xf32>
    %106 = arith.addf %103, %105 : vector<8x128xf32>
    %c0_31 = arith.constant 0 : index
    %c0_32 = arith.constant 0 : index
    %107 = vector.load %arg5[%c0_31, %c0_32] : memref<8x128xf32, #tpu.memory_space<vmem>>, vector<8x128xf32>
    tpu.vector_store %arg5[%c0_31, %c0_32], %106 {strides = array<i32>} : memref<8x128xf32, #tpu.memory_space<vmem>>, vector<8x128xf32>,
    return
  }
  func.func @transform_0(%arg0: i32) -> (i32, i32) {
    %c0_i32 = arith.constant 0 : i32
    %c0_i32_0 = arith.constant 0 : i32
    return %arg0, %c0_i32 : i32, i32
  }
  func.func @transform_1(%arg0: i32) -> (i32, i32) {
    %c0_i32 = arith.constant 0 : i32
    %c0_i32_0 = arith.constant 0 : i32
    %c0_i32_1 = arith.constant 0 : i32
    return %c0_i32, %c0_i32_0 : i32, i32
  }
  func.func @transform_2(%arg0: i32) -> (i32, i32) {
    %c0_i32 = arith.constant 0 : i32
    %c0_i32_0 = arith.constant 0 : i32
    %c0_i32_1 = arith.constant 0 : i32
    return %c0_i32, %c0_i32_0 : i32, i32
  }
  func.func @transform_3(%arg0: i32) -> (i32, i32) {
    %c0_i32 = arith.constant 0 : i32
    %c0_i32_0 = arith.constant 0 : i32
    %c0_i32_1 = arith.constant 0 : i32
    return %c0_i32, %c0_i32_0 : i32, i32
  }
  func.func @transform_4(%arg0: i32) -> (i32, i32) {
    %c0_i32 = arith.constant 0 : i32
    %c0_i32_0 = arith.constant 0 : i32
    return %arg0, %c0_i32 : i32, i32
  }
}

</mosaic_0001>

<bundles_post_ra>
// kernel: tpu_custom_call.1
= control target key start
LH: loop header
LB: loop body
LE: loop exit
PB: predicated region body
PF: predicated region fallthrough
CT: control target
= control target key end

     0   :  { %9 = vsyncpa [#allocation4], 0  ;;  %s2000_s0 = inlined_call_operand.hbm [shape: f32[16,128], index: 0, kind: input, shape index: {}]   ;;  %s2001_s1 = inlined_call_operand.hbm [shape: bf16[128,384], index: 1, kind: input, shape index: {}]   ;;  %s2002_s2 = inlined_call_operand.hbm [shape: bf16[128,128], index: 2, kind: input, shape index: {}]   ;;  %s2003_s3 = inlined_call_operand.vmem [shape: f32[1,128], index: 3, kind: input, shape index: {}]   ;;  %s2004_s4 = inlined_call_operand.hbm [shape: f32[16,128], index: 4, kind: output, shape index: {}]  }
   0x1   :  { %11 = vsyncpa [#allocation4 + $0x1], 0 }
   0x2   :  { %12 = vsyncpa [#allocation7], 0 }
   0x3   :  { %13 = vsyncpa [#allocation5], 0 }
   0x4   :  { %15 = vsyncpa [#allocation5 + $0x1], 0  ;;  %s1674_s15 = smov 0   ;;  %s1676_s16 = smov 0  }
   0x5   :  { %s1678_s17 = smov 0   ;;  %s1680_s18 = smov 0  }
   0x6 LB: > { %s1695_s19 = sadd.s32 4294967295, %s1633_s18   ;;  %s1165_s20 = sadd.s32 4294967294, %s1633_s18   ;;  %s1633_s18 = sphi %s1680_s18, %s2024_s18   ;;  %s1629_s17 = sphi %s1678_s17, %s2023_s17   ;;  %s1625_s16 = sphi %s1676_s16, %s2022_s16   ;;  %s1621_s15 = sphi %s1674_s15, %s2021_s15  }
   0x7   : > { %p41_p0 = scmp.ne.s32.totalorder %s1625_s16, %s1621_s15  ;;  %p2005_p1 = scmp.eq.s32.totalorder %s1695_s19, 0 }
   0x8   : > { %p134_p3 = scmp.eq.s32.totalorder %s1165_s20, 1  ;;  %p1166_p5 = scmp.ge.s32.totalorder %s1633_s18, 1 }
   0x9   : > { %p1704_p4 = por %p2005_p1, %p41_p0  ;;  %p141_p7 = scmp.lt.s32.totalorder %s1633_s18, 3 }
   0xa   : > { %p1709_p6 = por %p134_p3, %p41_p0  ;;  %s1635_s24 = smov [#allocation6]  }
   0xb   : > { %s2008_s21 = scalar_select %p1704_p4, 1, 0 }
   0xc   : > { %s2009_s22 = scalar_select %p1709_p6, 1, 0 }
   0xd   : > { %p1714_p8 = pnand %p1166_p5, %p141_p7  ;;  %s153_s25 = sshll.u32 %s1635_s24, 4  ;;  %s1718_s25 = int_to_ptr.vmem [resolvable:$true] %s153_s25 }
   0xe   : > { %s1636_s27 = smov [#allocation8]   ;;  %s1477_s5 = scalar_lea.hbm %s2001_s1, 3072 }
   0xf   : > { %p1356_p9 = pneg %p1714_p8  ;;  %s166_s28 = sshll.u32 %s1636_s27, 4  ;;  %s1729_s28 = int_to_ptr.vmem [resolvable:$true] %s166_s28 }
  0x10   : > { %p1478_p12 = scmp.ne.s32.totalorder %s2001_s1, %s1477_s5  ;;  %p1484_p5 = scmp.lt.u32.totalorder %s1477_s5, %s2001_s1 }
  0x11   : > { %p1725_p11 = pnand %p1356_p9, %p2005_p1 }
  0x13   : > { %p1479_p13 = pneg %p1725_p11 }
  0x15   : > { %p1480_p0 = pnand %p1479_p13, %p1478_p12 }
  0x17   : > { %p1481_p3 = pneg %p1480_p0 }
  0x19   : > { %p1486_p7 = pnand %p1484_p5, %p1481_p3 }
  0x1b   : > { %1489 = shalt.err (!%p1486_p7)
}
  0x1c   : > { %s1490_s10 = scalar_lea.vmem %s1718_s25, 3072  ;;  %p1498_p2 = scmp.lt.s32.totalorder %s1718_s25, %s1718_s25 }
  0x1d   : > { %p1491_p9 = scmp.ne.s32.totalorder %s1718_s25, %s1490_s10  ;;  %p1499_p12 = scmp.lt.s32.totalorder %s1490_s10, %s1490_s10 }
  0x1f   : > { %p1493_p10 = pnand %p1491_p9, %p1479_p13  ;;  %p1500_p0 = por %p1499_p12, %p1498_p2 }
  0x21   : > { %p1494_p1 = pneg %p1493_p10 }
  0x23   : > { %p1501_p6 = pnand %p1500_p0, %p1494_p1 }
  0x25   : > { %1504 = shalt.err (!%p1501_p6)
}
  0x26   : > { %s1637_s11 = smov 192   ;;  %s1638_s12 = smov 12  }
  0x27   : > { %1359 = dma.hbm_to_vmem [thread:$0]  (!%p1725_p11), %s2001_s1, 3072, %s1718_s25, [#allocation7], %s1637_s11, %s1637_s11, %s1638_s12  }
  0x28   : > { %s1505_s27 = scalar_lea.hbm %s2002_s2, 1024 }
  0x29   : > { %p1506_p2 = scmp.ne.s32.totalorder %s2002_s2, %s1505_s27  ;;  %p1512_p10 = scmp.lt.u32.totalorder %s1505_s27, %s2002_s2 }
  0x2b   : > { %p1508_p1 = pnand %p1506_p2, %p1479_p13 }
  0x2d   : > { %p1509_p6 = pneg %p1508_p1 }
  0x2f   : > { %p1514_p3 = pnand %p1512_p10, %p1509_p6 }
  0x31   : > { %1517 = shalt.err (!%p1514_p3)
}
  0x32   : > { %s1518_s25 = scalar_lea.vmem %s1729_s28, 1024  ;;  %p1526_p12 = scmp.lt.s32.totalorder %s1729_s28, %s1729_s28 }
  0x33   : > { %p1519_p5 = scmp.ne.s32.totalorder %s1729_s28, %s1518_s25  ;;  %p1527_p0 = scmp.lt.s32.totalorder %s1518_s25, %s1518_s25 }
  0x35   : > { %p1521_p7 = pnand %p1519_p5, %p1479_p13  ;;  %p1528_p2 = por %p1527_p0, %p1526_p12 }
  0x37   : > { %p1522_p9 = pneg %p1521_p7 }
  0x39   : > { %p1529_p1 = pnand %p1528_p2, %p1522_p9 }
  0x3b   : > { %1532 = shalt.err (!%p1529_p1)
}
  0x3c   : > { %s1639_s7 = smov 64   ;;  %s1640_s8 = smov 4  }
  0x3d   : > { %1362 = dma.hbm_to_vmem [thread:$0]  (!%p1725_p11), %s2002_s2, 1024, %s1729_s28, [#allocation7], %s1639_s7, %s1639_s7, %s1640_s8  }
  0x3e   : > { %s1784_s11 = sadd.s32 1, %s1633_s18   ;;  %s28_s13 = sadd.s32 1, %s1629_s17 }
  0x3f   : > { %s25_s12 = ssub.s32 %s1633_s18, %s1784_s11  ;;  %p35_p6 = scmp.ne.s32.totalorder %s1629_s17, %s1625_s16 }
  0x40   : > { %p26_p13 = scmp.eq.s32.totalorder %s25_s12, 0  ;;  %p36_p10 = scmp.eq.s32.totalorder %s1633_s18, 0 }
  0x41   : > { %p2012_p5 = scmp.eq.s32.totalorder %s1695_s19, 1  ;;  %p1373_p9 = scmp.lt.s32.totalorder %s1633_s18, 2 }
  0x42   : > { %s1793_s14 = scalar_select %p26_p13, %s1629_s17, %s28_s13  }
  0x43   : > { %p37_p3 = por %p36_p10, %p35_p6  ;;  %p1797_p7 = por %p2012_p5, %p35_p6 }
  0x44   : > { %s183_s26 = sand.u32 1, %s1629_s17   ;;  %s1171_s28 = sshll.u32 %s1633_s18, 7 }
  0x45   : > { %s2013_s20 = scalar_select %p1797_p7, 1, 0 }
  0x46   : > { %s1170_s24 = sshll.u32 %s183_s26, 3  ;;  %s1807_s30 = scalar_lea.hbm %s2000_s0, %s1171_s28 }
  0x47   : > { %s187_s5 = scalar_lea.vmem [#allocation3], %s1170_s24  ;;  %p1811_p11 = pnand %p1373_p9, %p37_p3 }
  0x48   : > { %s194_s6 = sshll.u32 %s187_s5, 4  ;;  %s184_s7 = scalar_lea.sflag [#allocation4], %s183_s26  ;;  %s1809_s6 = int_to_ptr.vmem [resolvable:$true] %s194_s6 }
  0x49   : > { %s1533_s8 = scalar_lea.hbm %s1807_s30, 128  ;;  %p1535_p0 = pneg %p1811_p11 }
  0x4a   : > { %p1534_p12 = scmp.ne.s32.totalorder %s1807_s30, %s1533_s8  ;;  %s1538_s12 = scalar_lea.hbm %s2000_s0, 256 }
  0x4b   : > { %p1539_p13 = scmp.lt.u32.totalorder %s1807_s30, %s2000_s0  ;;  %p1540_p6 = scmp.lt.u32.totalorder %s1538_s12, %s1533_s8 }
  0x4c   : > { %p1536_p2 = pnand %p1535_p0, %p1534_p12  ;;  %p1542_p3 = scmp.lt.u32.totalorder %s1533_s8, %s1807_s30 }
  0x4d   : > { %p1541_p10 = por %p1540_p6, %p1539_p13 }
  0x4e   : > { %p1537_p1 = pneg %p1536_p2 }
  0x4f   : > { %p1543_p5 = por %p1542_p3, %p1541_p10 }
  0x51   : > { %p1544_p9 = pnand %p1543_p5, %p1537_p1 }
  0x53   : > { %1547 = shalt.err (!%p1544_p9)
}
  0x54   : > { %s1548_s26 = scalar_lea.vmem %s1809_s6, 128  ;;  %s1641_s28 = smov [#allocation3]  }
  0x55   : > { %p1549_p12 = scmp.ne.s32.totalorder %s1809_s6, %s1548_s26  ;;  %s1553_s27 = sshll.u32 %s1641_s28, 4  ;;  %s1554_s27 = int_to_ptr.vmem [resolvable:$false] %s1553_s27 }
  0x56   : > { %s1555_s29 = scalar_lea.vmem %s1554_s27, 256  ;;  %p1556_p4 = scmp.lt.s32.totalorder %s1809_s6, %s1554_s27 }
  0x57   : > { %p1551_p2 = pnand %p1549_p12, %p1535_p0  ;;  %p1557_p13 = scmp.lt.s32.totalorder %s1555_s29, %s1548_s26 }
  0x59   : > { %p1552_p7 = pneg %p1551_p2  ;;  %p1558_p6 = por %p1557_p13, %p1556_p4 }
  0x5b   : > { %p1559_p10 = pnand %p1558_p6, %p1552_p7 }
  0x5d   : > { %1562 = shalt.err (!%p1559_p10)
}
  0x5e   : > { %1366 = dma.hbm_to_vmem [thread:$0]  (!%p1811_p11), %s1807_s30, 128, %s1809_s6, %s184_s7  }
  0x5f   : > { %203 = sbr.rel (%p1714_p8) target bundleno = 1698 (0x6a2), region = 36  ;;  %s1843_s5 = sand.u32 (!%p1714_p8), 1, %s1625_s16  }
  0x60   : > { %s1173_s8 = sshll.u32 (!%p1714_p8), %s1843_s5, 3  ;;  %s206_s9 = scalar_lea.sflag (!%p1714_p8), [#allocation4], %s1843_s5 }
  0x61   : > { %s1849_s10 = scalar_lea.vmem (!%p1714_p8), [#allocation3], %s1173_s8  ;;  %p2015_p4 = scmp.ne.s32.totalorder (!%p1714_p8), %s2008_s21, 0 }
  0x66   : > { %1608 = dma.done.wait (%p2015_p4), %s206_s9, 128  }
  0x67   : > { %1610 = vsyncadd (%p2015_p4), %s206_s9, 4294967168  ;;  %p2016_p7 = scmp.eq.s32.totalorder %s1695_s19, 0 }
  0x69   : > { %1612 = dma.done.wait (%p2016_p7), [#allocation7], 4096   ;;  %p2017_p8 = pmov %p2016_p7 }
  0x6a   : > { %v1642_v0 = vmov 0   ;;  %v1643_v1 = vmov 0.0   ;;  %v1421_v2 = vld [vmem:[#allocation6 + $0x4] ss:$12 sps:$4 sm:$0xff]   ;;  %v1423_v3 = vld [vmem:[#allocation6] ss:$12 sps:$4 sm:$0xff]  }
  0x6b   : > { %1614 = vsyncadd (%p2017_p8), [#allocation7], 4294963200  ;;  %437 = vmatprep.mubr.bf16.mxu0 %v1642_v0  ;;  %1256 = vmatprep.subr.bf16.mxu1 %v1643_v1  ;;  %v1424_v4 = vld [vmem:[#allocation6 + $0x1c] ss:$12 sps:$4 sm:$0xff]   ;;  %v1426_v5 = vld [vmem:[#allocation6 + $0x18] ss:$12 sps:$4 sm:$0xff]  }
  0x6c   : > { %405 = vmatprep.subr.bf16.mxu0 %v1421_v2  ;;  %v1427_v6 = vld [vmem:[#allocation6 + $0x34] ss:$12 sps:$4 sm:$0xff]   ;;  %v1429_v7 = vld [vmem:[#allocation6 + $0x30] ss:$12 sps:$4 sm:$0xff]   ;;  %v1430_v8 = vld [vmem:[#allocation6 + $0x4c] ss:$12 sps:$4 sm:$0xff]  }
  0x6d   : > { %406 = vmatpush1.bf16.msra.mxu0 %v1423_v3  ;;  %v1432_v9 = vld [vmem:[#allocation6 + $0x48] ss:$12 sps:$4 sm:$0xff]   ;;  %v1433_v11 = vld [vmem:[#allocation6 + $0x64] ss:$12 sps:$4 sm:$0xff]   ;;  %v1446_v12 = vld [vmem:[#allocation6 + $0x20] ss:$12 sps:$4 sm:$0xff]  }
  0x6e   : > { %407 = vmatprep.subr.bf16.mxu0 %v1424_v4  ;;  %v1445_v10 = vld [vmem:[#allocation6 + $0x8] ss:$12 sps:$4 sm:$0xff]   ;;  %v1435_v13 = vld [vmem:[#allocation6 + $0x60] ss:$12 sps:$4 sm:$0xff]   ;;  %v1438_v15 = vld [vmem:[#allocation6 + $0x78] ss:$12 sps:$4 sm:$0xff]  }
  0x6f   : > { %1257 = vmatpush3.bf16.msra.mxu1 %v1445_v10  ;;  %v1436_v14 = vld [vmem:[#allocation6 + $0x7c] ss:$12 sps:$4 sm:$0xff]   ;;  %v1447_v16 = vld [vmem:[#allocation6 + $0x38] ss:$12 sps:$4 sm:$0xff]   ;;  %v1439_v17 = vld [vmem:[#allocation6 + $0x94] ss:$12 sps:$4 sm:$0xff]  }
  0x70   : > { %1258 = vmatprep.subr.bf16.mxu1 %v1643_v1  ;;  %v1448_v18 = vld [vmem:[#allocation6 + $0x50] ss:$12 sps:$4 sm:$0xff]   ;;  %v1442_v20 = vld [vmem:[#allocation6 + $0xac] ss:$12 sps:$4 sm:$0xff]   ;;  %v1449_v21 = vld [vmem:[#allocation6 + $0x68] ss:$12 sps:$4 sm:$0xff]  }
  0x71   : > { %408 = vmatpush1.bf16.msra.mxu0 %v1426_v5  ;;  %v1441_v19 = vld [vmem:[#allocation6 + $0x90] ss:$12 sps:$4 sm:$0xff]   ;;  %v1444_v22 = vld [vmem:[#allocation6 + $0xa8] ss:$12 sps:$4 sm:$0xff]   ;;  %v1450_v24 = vld [vmem:[#allocation6 + $0x80] ss:$12 sps:$4 sm:$0xff]  }
  0x72   : > { %409 = vmatprep.subr.bf16.mxu0 %v1427_v6  ;;  %v243_v23 = vld [vmem:[%s1849_s10] sm:$0xff]  ;;  %vm1644_vm0 = vmmov 0   ;;  %vm489_vm1 = vcmask 261120   ;;  %s1645_s21 = smov 96   ;;  %s1646_s23 = smov 64   ;;  %vm551_vm2 = vcmask 1043456  }
  0x73   : > { %1259 = vmatpush3.bf16.msra.mxu1 %v1446_v12  ;;  %v244_v25 = vpack.c.bf16 %v243_v23, %v243_v23  ;;  %v1451_v26 = vld [vmem:[#allocation6 + $0x98] ss:$12 sps:$4 sm:$0xff]   ;;  %v1452_v27 = vld [vmem:[#allocation6 + $0xb0] ss:$12 sps:$4 sm:$0xff]   ;;  %1272 = vmatprep.mubr.msk.bf16.mxu1 %vm1644_vm0, %v1643_v1  ;;  %s1647_s30 = smov 32   ;;  %vm536_vm3 = vcmask 64512  }
  0x74   : > { %1260 = vmatprep.subr.bf16.mxu1 %v1643_v1  ;;  %vm714_vm4 = vcmask 523520   ;;  %vm830_vm5 = vcmask 785920   ;;  %vm946_vm6 = vcmask 1048320   ;;  %s1219_s7 = sshll.u32 %s1695_s19, 7  ;;  %s241_s12 = scalar_lea.vmem [#allocation9], %s1173_s8 }
  0x75   : > { %410 = vmatpush1.bf16.msra.mxu0 %v1429_v7  ;;  %s1076_s13 = sshll.u32 %s241_s12, 4  ;;  %s1956_s28 = scalar_lea.hbm %s2004_s4, %s1219_s7  ;;  %s1958_s13 = int_to_ptr.vmem [resolvable:$true] %s1076_s13 }
  0x76   : > { %411 = vmatprep.subr.bf16.mxu0 %v1430_v8  ;;  %s1063_s19 = scalar_lea.sflag [#allocation5], %s1843_s5  ;;  %s1563_s27 = scalar_lea.vmem %s1958_s13, 128 }
  0x77   : > { %1261 = vmatpush3.bf16.msra.mxu1 %v1447_v16  ;;  %p1564_p11 = scmp.ne.s32.totalorder %s1958_s13, %s1563_s27  ;;  %p2018_p0 = scmp.ne.s32.totalorder %s2013_s20, 0 }
  0x78   : > { %1262 = vmatprep.subr.bf16.mxu1 %v1643_v1  ;;  %s1648_s29 = smov [#allocation9]  }
  0x79   : > { %412 = vmatpush1.bf16.msra.mxu0 %v1432_v9  ;;  %p1565_p1 = pnand %p1564_p11, %p2018_p0  ;;  %s1567_s8 = sshll.u32 %s1648_s29, 4  ;;  %s1568_s8 = int_to_ptr.vmem [resolvable:$false] %s1567_s8 }
  0x7a   : > { %413 = vmatprep.subr.bf16.mxu0 %v1433_v11  ;;  %s1569_s9 = scalar_lea.vmem %s1568_s8, 256  ;;  %p1570_p5 = scmp.lt.s32.totalorder %s1958_s13, %s1568_s8 }
  0x7b   : > { %1263 = vmatpush3.bf16.msra.mxu1 %v1448_v18  ;;  %p1566_p3 = pneg %p1565_p1  ;;  %p1571_p9 = scmp.lt.s32.totalorder %s1569_s9, %s1563_s27 }
  0x7c   : > { %1264 = vmatprep.subr.bf16.mxu1 %v1643_v1 }
  0x7d   : > { %414 = vmatpush1.bf16.msra.mxu0 %v1435_v13  ;;  %p1572_p12 = por %p1571_p9, %p1570_p5 }
  0x7e   : > { %415 = vmatprep.subr.bf16.mxu0 %v1436_v14 }
  0x7f   : > { %1265 = vmatpush3.bf16.msra.mxu1 %v1449_v21  ;;  %p1573_p2 = pnand %p1572_p12, %p1566_p3 }
  0x80   : > { %1266 = vmatprep.subr.bf16.mxu1 %v1643_v1 }
  0x81   : > { %416 = vmatpush1.bf16.msra.mxu0 %v1438_v15 }
  0x82   : > { %417 = vmatprep.subr.bf16.mxu0 %v1439_v17 }
  0x83   : > { %1267 = vmatpush3.bf16.msra.mxu1 %v1450_v24 }
  0x84   : > { %1268 = vmatprep.subr.bf16.mxu1 %v1643_v1 }
  0x85   : > { %418 = vmatpush1.bf16.msra.mxu0 %v1441_v19 }
  0x86   : > { %419 = vmatprep.subr.bf16.mxu0 %v1442_v20 }
  0x87   : > { %1269 = vmatpush3.bf16.msra.mxu1 %v1451_v26 }
  0x88   : > { %1270 = vmatprep.subr.bf16.mxu1 %v1643_v1 }
  0x89   : > { %420 = vmatpush1.bf16.msra.mxu0 %v1444_v22 }
  0x8a   : > { %1300 = vmatprep.subr.bf16.mxu0 %v1643_v1 }
  0x8b   : > { %1271 = vmatpush3.bf16.msra.mxu1 %v1452_v27 }
  0x8c   : > { %438 = vmatmul.mubr.bf16.vlgmr.msra.gmra.mrb[0].mxu0 %v244_v25  ;;  %1276 = vmatprep.subr.bf16.mxu1 %v1643_v1 }
  0x8d   : > { %1302 = vmatprep.mubr.msk.bf16.mxu0 %vm1644_vm0, %v1643_v1 }
  0x8e   : > { %1273 = vmatmul.mubr.bf16.vlgmr.msra.gmra.mrb[0].mxu1 %v244_v25 }
  0x8f   : > { %1278 = vmatprep.mubr.msk.bf16.mxu1 %vm1644_vm0, %v1643_v1 }
 0x15f   : > { %v439_v28 = vpop.f32.mrb[0].mxu0 }
 0x160   : > { %v486_v29 = vpack.c.bf16 %v439_v28, %v439_v28  ;;  %v441_v30 = vpop.f32.mrb[1].mxu0 }
 0x161   : > { %v487_v31 = vpack.c.bf16 %v441_v30, %v441_v30  ;;  %v443_v32 = vpop.f32.mrb[2].mxu0  ;;  %v480_v35 = vpop.f32.mrb[0].mxu1 }
 0x162   : > { %598 = vrot.lane.b32.xlu1 %v486_v29, %s1645_s21  ;;  %v444_v33 = vpop.f32.mrb[3].mxu0  ;;  %v1886_v36 = vpack.c.bf16 %v480_v35, %v480_v35  ;;  %v1274_v37 = vpop.f32.mrb[1].mxu1 }
 0x163   : > { %v494_v34 = vsel %vm489_vm1, %v487_v31, 0  ;;  %v483_v38 = vpop.f32.mrb[2].mxu1 }
 0x164   : > { %1277 = vmatpush3.bf16.xpose.msra.mxu1 %v494_v34  ;;  %v1275_v39 = vpop.f32.mrb[3].mxu1  ;;  %v553_v40 = vsel %vm551_vm2, %v1886_v36, 0 }
 0x165   : > { %1282 = vmatprep.subr.bf16.mxu1 %v1643_v1 }
 0x166   : > { %718 = vrot.lane.b32.xlu1 %v487_v31, %s1646_s23 }
 0x16a   : > { %716 = vrot.lane.b32.xlu1 %v486_v29, %s1646_s23 }
 0x16b   : > { %1279 = vmatmul.mubr.msk.bf16.vlgmr.msra.gmra.mrb[4].mxu1 %vm489_vm1, %v486_v29 }
 0x16c   : > { %1284 = vmatprep.mubr.msk.bf16.mxu1 %vm1644_vm0, %v1643_v1  ;;  %1283 = vmatpush3.bf16.msra.mxu1 %v553_v40 }
 0x16d   : > { %1288 = vmatprep.subr.bf16.mxu1 %v1643_v1 }
 0x16e   : > { %834 = vrot.lane.b32.xlu1 %v487_v31, %s1647_s30 }
 0x172   : > { %832 = vrot.lane.b32.xlu1 %v486_v29, %s1647_s30 }
 0x1d4   : > { %v599_v41 = vpop.permute.xlu1 %598 }
 0x1d8   : > { %v719_v42 = vpop.permute.xlu1 %718 }
 0x1d9   : > { %v724_v43 = vsel %vm489_vm1, %v719_v42, 0  ;;  %v1454_v42 = vld [vmem:[#allocation8 + $0x8] sm:$0xff]  }
 0x1da   : > { %1301 = vmatpush3.bf16.xpose.msra.mxu0 %v724_v43 }
 0x1db   : > { %1312 = vmatprep.subr.bf16.mxu0 %v1643_v1 }
 0x1dc   : > { %v717_v44 = vpop.permute.xlu1 %716 }
 0x1e0   : > { %v835_v45 = vpop.permute.xlu1 %834 }
 0x1e1   : > { %v840_v46 = vsel %vm489_vm1, %v835_v45, 0  ;;  %1303 = vmatmul.mubr.msk.bf16.vlgmr.msra.gmra.mrb[4].mxu0 %vm489_vm1, %v717_v44 }
 0x1e2   : > { %1313 = vmatpush3.bf16.xpose.msra.mxu0 %v840_v46  ;;  %1314 = vmatprep.mubr.msk.bf16.mxu0 %vm1644_vm0, %v1643_v1 }
 0x1e3   : > { %1324 = vmatprep.subr.bf16.mxu0 %v1643_v1 }
 0x1e4   : > { %v833_v47 = vpop.permute.xlu1 %832 }
 0x1e9   : > { %1315 = vmatmul.mubr.msk.bf16.vlgmr.msra.gmra.mrb[8].mxu0 %vm489_vm1, %v833_v47 }
 0x1ea   : > { %1340 = vmatprep.mubr.msk.bf16.mxu0 %vm1644_vm0, %v1643_v1 }
 0x23e   : > { %v530_v48 = vpop.f32.mrb[4].mxu1 }
 0x23f   : > { %v1280_v49 = vpop.f32.mrb[5].mxu1  ;;  %v537_v50 = vsel %vm536_vm3, %v530_v48, -inf }
 0x240   : > { %538 = vmax.xlane.f32.xlu0 %v537_v50  ;;  %v533_v51 = vpop.f32.mrb[6].mxu1  ;;  %v1456_v49 = vld [vmem:[#allocation8 + $0x18] sm:$0xff]  }
 0x241   : > { %v1281_v52 = vpop.f32.mrb[7].mxu1  ;;  %v1457_v51 = vld [vmem:[#allocation8 + $0x20] sm:$0xff]  }
 0x256   : > { %601 = vrot.lane.b32.xlu0 %v487_v31, %s1645_s21 }
 0x2b4   : > { %v760_v53 = vpop.f32.mrb[4].mxu0 }
 0x2b5   : > { %v1304_v54 = vpop.f32.mrb[5].mxu0  ;;  %v766_v55 = vsel %vm536_vm3, %v760_v53, -inf }
 0x2b6   : > { %767 = vmax.xlane.f32.xlu0 %v766_v55  ;;  %v763_v56 = vpop.f32.mrb[6].mxu0  ;;  %v1458_v54 = vld [vmem:[#allocation8 + $0x28] sm:$0xff]  }
 0x2b7   : > { %v1305_v57 = vpop.f32.mrb[7].mxu0 }
 0x2bc   : > { %v876_v58 = vpop.f32.mrb[8].mxu0 }
 0x2bd   : > { %v1316_v59 = vpop.f32.mrb[9].mxu0  ;;  %v882_v60 = vsel %vm536_vm3, %v876_v58, -inf }
 0x2be   : > { %883 = vmax.xlane.f32.xlu1 %v882_v60  ;;  %v879_v61 = vpop.f32.mrb[10].mxu0  ;;  %v1459_v59 = vld [vmem:[#allocation8 + $0x30] sm:$0xff]  }
 0x2bf   : > { %v1317_v62 = vpop.f32.mrb[11].mxu0 }
 0x2c0   : > { %v1460_v62 = vld [vmem:[#allocation8 + $0x38] sm:$0xff]  }
 0x2cc   : > { %661 = vrot.lane.b32.xlu0 %v1886_v36, %s1645_s21 }
 0x2cd   : > { %v539_v63 = vpop.xlane.xlu0 %538 }
 0x2ce   : > { %v540_v0 = vsub.f32 %v530_v48, %v539_v63  ;;  %v1455_v48 = vld [vmem:[#allocation8 + $0x10] sm:$0xff]  }
 0x2d0   : > { %v541_v2 = vmul.f32 1.442695, %v540_v0 }
 0x2d1   : > { %v602_v4 = vpop.permute.xlu0 %601 }
 0x2d2   : > { %1461 = vpow2.f32 %v541_v2  ;;  %v607_v6 = vsel %vm489_vm1, %v602_v4, 0 }
 0x2dc   : > { %v1462_v3 = vpop.eup %1461 }
 0x2dd   : > { %v547_v5 = vpack.c.bf16 %v1462_v3, %v1462_v3  ;;  %v543_v37 = vsel %vm536_vm3, %v1462_v3, 0.0 }
 0x2df   : > { %1285 = vmatmul.mubr.msk.bf16.vlgmr.msra.gmra.mrb[8].mxu1 %vm536_vm3, %v547_v5 }
 0x2e0   : > { %1289 = vmatpush3.bf16.xpose.msra.mxu1 %v607_v6  ;;  %1290 = vmatprep.mubr.msk.bf16.mxu1 %vm1644_vm0, %v1643_v1 }
 0x2e1   : > { %1294 = vmatprep.subr.bf16.mxu1 %v1643_v1 }
 0x2e7   : > { %1291 = vmatmul.mubr.msk.bf16.vlgmr.msra.gmra.mrb[12].mxu1 %vm489_vm1, %v599_v41  ;;  %v1453_v41 = vld [vmem:[#allocation8] sm:$0xff]  }
 0x2e8   : > { %1296 = vmatprep.mubr.msk.bf16.mxu1 %vm1644_vm0, %v1643_v1  ;;  %1325 = vmatpush3.bf16.msra.mxu0 %v1453_v41 }
 0x2e9   : > { %1326 = vmatprep.subr.bf16.mxu0 %v1643_v1 }
 0x2ec   : > { %1327 = vmatpush3.bf16.msra.mxu0 %v1454_v42 }
 0x2ed   : > { %1328 = vmatprep.subr.bf16.mxu0 %v1643_v1 }
 0x2f0   : > { %1329 = vmatpush3.bf16.msra.mxu0 %v1455_v48 }
 0x2f1   : > { %1330 = vmatprep.subr.bf16.mxu0 %v1643_v1 }
 0x2f4   : > { %1331 = vmatpush3.bf16.msra.mxu0 %v1456_v49 }
 0x2f5   : > { %1332 = vmatprep.subr.bf16.mxu0 %v1643_v1 }
 0x2f8   : > { %1333 = vmatpush3.bf16.msra.mxu0 %v1457_v51 }
 0x2f9   : > { %1334 = vmatprep.subr.bf16.mxu0 %v1643_v1 }
 0x2fc   : > { %1335 = vmatpush3.bf16.msra.mxu0 %v1458_v54 }
 0x2fd   : > { %1336 = vmatprep.subr.bf16.mxu0 %v1643_v1 }
 0x300   : > { %1337 = vmatpush3.bf16.msra.mxu0 %v1459_v59 }
 0x301   : > { %1338 = vmatprep.subr.bf16.mxu0 %v1643_v1 }
 0x304   : > { %1339 = vmatpush3.bf16.msra.mxu0 %v1460_v62 }
 0x343   : > { %v768_v7 = vpop.xlane.xlu0 %767 }
 0x344   : > { %v769_v8 = vsub.f32 %v760_v53, %v768_v7 }
 0x346   : > { %v770_v20 = vmul.f32 1.442695, %v769_v8 }
 0x347   : > { %v662_v9 = vpop.permute.xlu0 %661 }
 0x348   : > { %v667_v10 = vsel %vm551_vm2, %v662_v9, 0  ;;  %1463 = vpow2.f32 %v770_v20 }
 0x349   : > { %1295 = vmatpush3.bf16.msra.mxu1 %v667_v10 }
 0x34a   : > { %1306 = vmatprep.subr.bf16.mxu1 %v1643_v1 }
 0x34b   : > { %v884_v23 = vpop.xlane.xlu1 %883 }
 0x34c   : > { %v885_v24 = vsub.f32 %v876_v58, %v884_v23 }
 0x34e   : > { %v886_v27 = vmul.f32 1.442695, %v885_v24 }
 0x352   : > { %v1464_v21 = vpop.eup %1463 }
 0x353   : > { %v772_v22 = vsel %vm536_vm3, %v1464_v21, 0.0  ;;  %v776_v38 = vpack.c.bf16 %v1464_v21, %v1464_v21 }
 0x3b2   : > { %v589_v11 = vpop.f32.mrb[8].mxu1 }
 0x3b3   : > { %v1286_v12 = vpop.f32.mrb[9].mxu1 }
 0x3b4   : > { %v592_v13 = vpop.f32.mrb[10].mxu1 }
 0x3b5   : > { %v1287_v14 = vpop.f32.mrb[11].mxu1 }
 0x3b6   : > { %v1209_v14 = vld [vmem:[%s2003_s3] ss:$0 sm:$0xff] }
 0x3ba   : > { %v643_v15 = vpop.f32.mrb[12].mxu1 }
 0x3bb   : > { %v1292_v16 = vpop.f32.mrb[13].mxu1  ;;  %v649_v17 = vsel %vm536_vm3, %v643_v15, -inf }
 0x3bc   : > { %v646_v18 = vpop.f32.mrb[14].mxu1  ;;  %650 = vmax.xlane.f32.xlu1 %v649_v17 }
 0x3bd   : > { %v1293_v19 = vpop.f32.mrb[15].mxu1 }
 0x3cd   : > { %777 = vrot.lane.b32.xlu1 %v1886_v36, %s1646_s23 }
 0x3d1   : > { %893 = vrot.lane.b32.xlu1 %v1886_v36, %s1647_s30 }
 0x3f5   : > { %773 = vadd.xlane.f32.xlu1 %v772_v22 }
 0x449   : > { %v651_v25 = vpop.xlane.xlu1 %650 }
 0x44a   : > { %v652_v26 = vsub.f32 %v643_v15, %v651_v25 }
 0x44c   : > { %v653_v28 = vmul.f32 1.442695, %v652_v26 }
 0x44d   : > { %v778_v30 = vpop.permute.xlu1 %777 }
 0x44e   : > { %1465 = vpow2.f32 %v653_v28  ;;  %v783_v34 = vsel %vm551_vm2, %v778_v30, 0 }
 0x44f   : > { %1467 = vpow2.f32 %v886_v27 }
 0x451   : > { %v894_v36 = vpop.permute.xlu1 %893 }
 0x452   : > { %v899_v39 = vsel %vm551_vm2, %v894_v36, 0 }
 0x458   : > { %v1466_v29 = vpop.eup %1465 }
 0x459   : > { %v655_v31 = vsel %vm536_vm3, %v1466_v29, 0.0  ;;  %v659_v32 = vpack.c.bf16 %v1466_v29, %v1466_v29  ;;  %v1468_v33 = vpop.eup %1467 }
 0x45a   : > { %656 = vadd.xlane.f32.xlu0 %v655_v31  ;;  %v888_v35 = vsel %vm536_vm3, %v1468_v33, 0.0  ;;  %v892_v40 = vpack.c.bf16 %v1468_v33, %v1468_v33 }
 0x45b   : > { %1297 = vmatmul.mubr.msk.bf16.vlgmr.msra.gmra.mrb[16].mxu1 %vm536_vm3, %v659_v32 }
 0x45c   : > { %1307 = vmatpush3.bf16.msra.mxu1 %v783_v34  ;;  %1308 = vmatprep.mubr.msk.bf16.mxu1 %vm1644_vm0, %v1643_v1 }
 0x45d   : > { %1318 = vmatprep.subr.bf16.mxu1 %v1643_v1 }
 0x45e   : > { %889 = vadd.xlane.f32.xlu0 %v888_v35 }
 0x462   : > { %544 = vadd.xlane.f32.xlu0 %v543_v37 }
 0x463   : > { %1309 = vmatmul.mubr.msk.bf16.vlgmr.msra.gmra.mrb[20].mxu1 %vm536_vm3, %v776_v38 }
 0x464   : > { %1319 = vmatpush3.bf16.msra.mxu1 %v899_v39  ;;  %1320 = vmatprep.mubr.msk.bf16.mxu1 %vm1644_vm0, %v1643_v1 }
 0x46b   : > { %1321 = vmatmul.mubr.msk.bf16.vlgmr.msra.gmra.mrb[24].mxu1 %vm536_vm3, %v892_v40 }
 0x482   : > { %v774_v50 = vpop.xlane.xlu1 %773 }
 0x4e7   : > { %v657_v43 = vpop.xlane.xlu0 %656 }
 0x4eb   : > { %v890_v44 = vpop.xlane.xlu0 %889 }
 0x4ef   : > { %v545_v45 = vpop.xlane.xlu0 %544 }
 0x4f0   : > { %1469 = vrcp.f32 %v545_v45 }
 0x4f1   : > { %1471 = vrcp.f32 %v657_v43 }
 0x4f2   : > { %1473 = vrcp.f32 %v774_v50 }
 0x4f3   : > { %1475 = vrcp.f32 %v890_v44 }
 0x4fa   : > { %v1470_v46 = vpop.eup %1469 }
 0x4fb   : > { %v595_v47 = vmul.f32 %v1470_v46, %v589_v11  ;;  %v1472_v52 = vpop.eup %1471 }
 0x4fc   : > { %v1474_v60 = vpop.eup %1473 }
 0x4fd   : > { %596 = vst.msk [vmem:[#allocation2] sm:$0xff] %vm489_vm1, %v595_v47  ;;  %v1476_v4 = vpop.eup %1475 }
 0x52e   : > { %v703_v53 = vpop.f32.mrb[16].mxu1 }
 0x52f   : > { %v709_v55 = vmul.f32 %v1472_v52, %v703_v53  ;;  %v1298_v56 = vpop.f32.mrb[17].mxu1 }
 0x530   : > { %v706_v57 = vpop.f32.mrb[18].mxu1 }
 0x531   : > { %v1299_v58 = vpop.f32.mrb[19].mxu1  ;;  %711 = vrot.lane.b32.xlu1 %v709_v55, %s1647_s30 }
 0x536   : > { %v819_v61 = vpop.f32.mrb[20].mxu1 }
 0x537   : > { %v825_v63 = vmul.f32 %v1474_v60, %v819_v61  ;;  %v1310_v0 = vpop.f32.mrb[21].mxu1 }
 0x538   : > { %v822_v2 = vpop.f32.mrb[22].mxu1 }
 0x539   : > { %v1311_v3 = vpop.f32.mrb[23].mxu1  ;;  %827 = vrot.lane.b32.xlu0 %v825_v63, %s1646_s23 }
 0x53e   : > { %v935_v5 = vpop.f32.mrb[24].mxu1 }
 0x53f   : > { %v941_v6 = vmul.f32 %v1476_v4, %v935_v5  ;;  %v1322_v7 = vpop.f32.mrb[25].mxu1 }
 0x540   : > { %v938_v8 = vpop.f32.mrb[26].mxu1 }
 0x541   : > { %943 = vrot.lane.b32.xlu1 %v941_v6, %s1645_s21  ;;  %v1323_v9 = vpop.f32.mrb[27].mxu1 }
 0x5a3   : > { %v712_v10 = vpop.permute.xlu1 %711 }
 0x5a4   : > { %715 = vst.msk [vmem:[#allocation2] sm:$0xff] %vm714_vm4, %v712_v10 }
 0x5ab   : > { %v828_v1 = vpop.permute.xlu0 %827 }
 0x5ac   : > { %831 = vst.msk [vmem:[#allocation2] sm:$0xff] %vm830_vm5, %v828_v1 }
 0x5b3   : > { %v944_v11 = vpop.permute.xlu1 %943 }
 0x5b4   : > { %947 = vst.msk [vmem:[#allocation2] sm:$0xff] %vm946_vm6, %v944_v11 }
 0x5bb   : > { %v948_v12 = vld [vmem:[#allocation2] sm:$0xff] }
 0x5bc   : > { %v949_v13 = vpack.c.bf16 %v948_v12, %v948_v12 }
 0x5be   : > { %1341 = vmatmul.mubr.bf16.vlgmr.msra.gmra.mrb[12].mxu0 %v949_v13 }
 0x691   : > { %v1055_v15 = vpop.f32.mrb[12].mxu0 }
 0x692   : > { %v1056_v16 = vadd.f32 %v1209_v14, %v1055_v15  ;;  %v1342_v17 = vpop.f32.mrb[13].mxu0 }
 0x693   : > { %v1058_v18 = vpop.f32.mrb[14].mxu0 }
 0x694   : > { %1061 = vst [vmem:[%s241_s12] sm:$0xff] %v1056_v16  ;;  %v1343_v19 = vpop.f32.mrb[15].mxu0 }
 0x695   : > { %1576 = shalt.err (!%p1573_p2)
}
 0x696   : > { %s1577_s5 = scalar_lea.hbm %s1956_s28, 128  ;;  %s1581_s23 = scalar_lea.hbm %s2004_s4, 256 }
 0x697   : > { %p1578_p13 = scmp.ne.s32.totalorder %s1956_s28, %s1577_s5  ;;  %p1582_p4 = scmp.lt.u32.totalorder %s1956_s28, %s2004_s4 }
 0x698   : > { %p1583_p7 = scmp.lt.u32.totalorder %s1581_s23, %s1577_s5  ;;  %p1585_p11 = scmp.lt.u32.totalorder %s1577_s5, %s1956_s28 }
 0x699   : > { %p1579_p6 = pnand %p1578_p13, %p2018_p0 }
 0x69a   : > { %p1584_p8 = por %p1583_p7, %p1582_p4 }
 0x69b   : > { %p1580_p10 = pneg %p1579_p6 }
 0x69c   : > { %p1586_p1 = por %p1585_p11, %p1584_p8 }
 0x69e   : > { %p1587_p3 = pnand %p1586_p1, %p1580_p10 }
 0x6a0   : > { %1590 = shalt.err (!%p1587_p3)
}
 0x6a1   : > { %1354 = dma.vmem_to_hbm [thread:$0]  (%p2018_p0), %s1958_s13, 128, %s1956_s28, %s1063_s19  }
 0x6a2 PF: > { %s1088_s25 = sand.u32 1, %s1621_s15   ;;  %p2019_p5 = scmp.ne.s32.totalorder %s2009_s22, 0 }
 0x6a3   : > { %p2020_p9 = scmp.ge.s32.totalorder %s1633_s18, 2  ;;  %s1089_s7 = scalar_lea.sflag [#allocation5], %s1088_s25 }
 0x6a5   : > { %p1368_p12 = pnand %p2020_p9, %p2019_p5 }
 0x6a7   : > { %1616 = dma.done.wait (!%p1368_p12), %s1089_s7, 128  }
 0x6a8   : > { %1618 = vsyncadd (!%p1368_p12), %s1089_s7, 4294967168  ;;  %p18_p2 = scmp.ge.s32.totalorder %s1784_s11, 4   ;;  %s2021_s15 = smov %s1625_s16 }
 0x6a9   : > { %s2022_s16 = smov %s1629_s17  ;;  %s2023_s17 = smov %s1793_s14 }
 0x6aa   : > { %s2024_s18 = smov %s1784_s11  ;;  %20 = sbr.rel (!%p18_p2) target bundleno = 6 (0x6), region = 89 }
 0x6b1   :  { %1094 = vsyncpa [#allocation4], 1 }
 0x6b2   :  { %1096 = vsyncpa [#allocation4 + $0x1], 1 }
 0x6b3   :  { %1097 = vsyncpa [#allocation7], 1 }
 0x6b4   :  { %1098 = vsyncpa [#allocation5], 1 }
 0x6b5   :  { %1100 = vsyncpa [#allocation5 + $0x1], 1 }

</bundles_post_ra>
